<compile_context>
chip_gen: v7x
topology: tpu7x:2x2x1
jax: 0.10.0
libtpu: 0.0.40
codegen_flags: <defaults>
</compile_context>

<pallas_src>
import functools
import math

import numpy as np

import jax
import jax.numpy as jnp
from jax.experimental import pallas as pl
from jax.experimental.pallas import tpu as pltpu

OUT_POOL_SIZE = (1, 3, 6, 8, 10, 16)


# ---------------------------------------------------------------------------
# Generation-aware VMEM budgets
# ---------------------------------------------------------------------------
def _tpu_vmem_capacity_bytes():
    try:
        return int(pltpu.get_tpu_info().vmem_capacity_bytes)
    except Exception:                      # pragma: no cover - conservative
        return 64 << 20                    # v7x-sized fallback


def _vmem_limit_bytes():
    # Explicit scoped-VMEM limit: half of physical VMEM (v5e/v6e: 64 MiB,
    # v7x: 32 MiB).  Overrides v5e's tight 16 MiB scoped default.
    return int(min(_tpu_vmem_capacity_bytes() // 2, 64 << 20))


def _weight_block_budget_bytes():
    # Per weight block, single buffer; double-buffered this stays well inside
    # the explicit limit above on every generation (v5e/v6e 8 MiB, v7x 4 MiB).
    return _tpu_vmem_capacity_bytes() // 16


def _spp_block_budget_bytes():
    return _tpu_vmem_capacity_bytes() // 8


# ---------------------------------------------------------------------------
# 1-D spatial pyramid max pooling (SPP)
# ---------------------------------------------------------------------------
def _spp_kernel(x_ref, o_ref, *, L, C, out_pool_size):
    """x_ref: (bn, L, C) block, channels on lanes.  o_ref: (bn, sum(sizes), C)."""
    bn = x_ref.shape[0]

    def tree_max(parts):
        # Balanced max tree: dependency depth ceil(log2(n)) instead of n.
        while len(parts) > 1:
            nxt = [jnp.maximum(a, b) for a, b in zip(parts[::2], parts[1::2])]
            if len(parts) % 2:
                nxt.append(parts[-1])
            parts = nxt
        return parts[0]

    off = 0
    for s in out_pool_size:
        wid = -(-L // s)                     # ceil(L/s): window size == stride
        n_real = -(-L // wid)                # windows containing real data (<= s)
        w_last = L - (n_real - 1) * wid      # valid elements in last real window

        def rows(k, count, wid=wid):
            # Element k of the first `count` windows: sublane-strided,
            # lane-dense load already in the output layout; maxima stay on
            # the VPU (no cross-lane XLU reduce).
            if count == 1 or wid == 1:
                return x_ref[:, pl.ds(k, count), :]
            return x_ref[:, pl.ds(k, count, stride=wid), :]

        if w_last == wid:
            # All real windows are full: one tree over the wid positions.
            m = tree_max([rows(k, n_real) for k in range(wid)])
            o_ref[:, off:off + n_real, :] = m.astype(o_ref.dtype)
        else:
            if n_real > 1:
                head = tree_max([rows(k, n_real - 1) for k in range(wid)])
                o_ref[:, off:off + n_real - 1, :] = head.astype(o_ref.dtype)
            # Last real window is partial: remaining positions are the zero
            # padding (matches F.pad(constant=0) + MaxPool1d semantics).
            tail = tree_max([x_ref[:, pl.ds((n_real - 1) * wid + k, 1), :]
                             for k in range(w_last)])
            tail = jnp.maximum(tail, 0.0)
            o_ref[:, off + n_real - 1:off + n_real, :] = tail.astype(o_ref.dtype)

        if n_real < s:
            # Windows lying entirely inside the right zero padding.
            o_ref[:, off + n_real:off + s, :] = jnp.zeros(
                (bn, s - n_real, C), o_ref.dtype)
        off += s


def _pick_spp_block_n(N, C, L, S, itemsize):
    budget = _spp_block_budget_bytes()
    per_sample = (L * C + S * C) * itemsize * 2     # double-buffered in + out
    block_n = 1
    for d in range(1, N + 1):
        if N % d != 0 or d * per_sample > budget:
            continue
        if N >= 2 and N // d < 2:
            continue   # keep >= 2 grid steps so megacore can split the batch
        block_n = d
    # TODO(synk): if one sample exceeds the budget (huge L*C), add an inner
    # "arbitrary" L grid axis with a running-max VMEM accumulator.
    return block_n


def spp_1d(x, out_pool_size=OUT_POOL_SIZE, *, block_n=None, out_dtype=None):
    """1-D SPP max pooling.

    x: (N, L, C) channels-last feature map (what the injected conv backbone
    should emit on TPU).  Returns (N, sum(sizes) * C) flattened in kernel
    order (pyramid-position-major, channel-minor); use _spp_col_permutation
    to map weights that expect the PyTorch (channel-major) flattening.
    """
    out_pool_size = tuple(int(s) for s in out_pool_size)
    N, L, C = x.shape
    S = sum(out_pool_size)
    itemsize = x.dtype.itemsize
    out_dtype = out_dtype or x.dtype

    if block_n is None:
        block_n = _pick_spp_block_n(N, C, L, S, itemsize)
    assert N % block_n == 0, (N, block_n)
    grid = (N // block_n,)

    kernel = functools.partial(_spp_kernel, L=L, C=C,
                               out_pool_size=out_pool_size)
    pooled = pl.pallas_call(
        kernel,
        grid=grid,
        in_specs=[pl.BlockSpec((block_n, L, C), lambda i: (i, 0, 0))],
        out_specs=pl.BlockSpec((block_n, S, C), lambda i: (i, 0, 0)),
        out_shape=jax.ShapeDtypeStruct((N, S, C), out_dtype),
        compiler_params=pltpu.CompilerParams(
            dimension_semantics=("parallel",),
            vmem_limit_bytes=_vmem_limit_bytes()),
        cost_estimate=pl.CostEstimate(
            flops=N * C * L * len(out_pool_size),
            transcendentals=0,
            bytes_accessed=N * L * C * itemsize
                           + N * S * C * jnp.dtype(out_dtype).itemsize),
    )(x)
    # Single no-copy reshape; the old per-level transpose/reshape/concat loop
    # is replaced by a one-time row permutation of w1 (see prepare_params).
    return pooled.reshape(N, S * C)


def _spp_col_permutation(C, out_pool_size=OUT_POOL_SIZE):
    """perm such that kernel-order column i == PyTorch-order column perm[i]."""
    perm = []
    off = 0
    for s in out_pool_size:
        for j in range(s):
            for c in range(C):
                perm.append(C * off + c * s + j)
        off += s
    return np.asarray(perm, dtype=np.int32)


# ---------------------------------------------------------------------------
# Linear (+ optional ReLU) : weight-streaming MXU matmul, f32 accumulator
# ---------------------------------------------------------------------------
def _pick_block_n(N):
    # Split the output dim into two lane-aligned tiles when possible so the
    # "parallel" grid axis can be sharded across TensorCores (v7x megacore).
    if N % 256 == 0:
        return N // 2
    return N


def _pick_block_k(K, bn, itemsize, budget_bytes):
    # Largest lane-aligned divisor of K whose (bk, bn) weight block fits the
    # per-stream VMEM budget.
    best = None
    for bk in range(128, K + 1, 128):
        if K % bk == 0 and bk * bn * itemsize <= budget_bytes:
            best = bk
    if best is not None:
        return best
    for bk in range(K, 0, -1):             # fallback: any divisor that fits
        if K % bk == 0 and bk * bn * itemsize <= budget_bytes:
            return bk
    raise ValueError(
        f"weight block ({K}x{bn}, {itemsize}B) does not fit the VMEM budget "
        f"({budget_bytes}B); shrink bn or pad K")


def _linear_kernel(x_ref, w_ref, b_ref, o_ref, acc_ref, *, apply_relu):
    k = pl.program_id(1)

    @pl.when(k == 0)
    def _():
        acc_ref[...] = jnp.zeros_like(acc_ref)

    acc_ref[...] += jnp.dot(x_ref[...], w_ref[...],
                            preferred_element_type=jnp.float32)

    @pl.when(k == pl.num_programs(1) - 1)
    def _():
        out = acc_ref[...] + b_ref[...].astype(jnp.float32)
        if apply_relu:
            out = jnp.maximum(out, 0.0)
        o_ref[...] = out.astype(o_ref.dtype)


def linear(x, w, b, *, apply_relu=False, out_dtype=None):
    """y = x @ w + b (optionally ReLU).  x: (M, K), w: (K, N), b: (N,).

    Grid = (parallel N tiles, arbitrary K tiles) with an f32 VMEM accumulator;
    pass bf16 x/w for the weight-streaming fast path.
    """
    M, K = x.shape
    Kw, N = w.shape
    assert K == Kw and b.shape == (N,)
    out_dtype = out_dtype or x.dtype
    bn = _pick_block_n(N)
    bk = _pick_block_k(K, bn, w.dtype.itemsize, _weight_block_budget_bytes())
    assert N % bn == 0 and K % bk == 0

    kernel = functools.partial(_linear_kernel, apply_relu=apply_relu)
    return pl.pallas_call(
        kernel,
        grid=(N // bn, K // bk),
        in_specs=[pl.BlockSpec((M, bk), lambda j, k: (0, k)),
                  pl.BlockSpec((bk, bn), lambda j, k: (k, j)),
                  pl.BlockSpec((1, bn), lambda j, k: (0, j))],
        out_specs=pl.BlockSpec((M, bn), lambda j, k: (0, j)),
        out_shape=jax.ShapeDtypeStruct((M, N), out_dtype),
        scratch_shapes=[pltpu.VMEM((M, bn), jnp.float32)],
        compiler_params=pltpu.CompilerParams(
            dimension_semantics=("parallel", "arbitrary"),
            vmem_limit_bytes=_vmem_limit_bytes()),
        cost_estimate=pl.CostEstimate(
            flops=2 * M * K * N,
            transcendentals=0,
            bytes_accessed=K * N * w.dtype.itemsize
                           + M * K * x.dtype.itemsize * (N // bn)
                           + M * N * jnp.dtype(out_dtype).itemsize),
    )(x, w, b.reshape(1, N))


# ---------------------------------------------------------------------------
# Fused second Linear + ReLU + top_layer (w3/b3 stay VMEM resident)
# ---------------------------------------------------------------------------
def _classifier_tail_kernel(x_ref, w_ref, b_ref, wt_ref, bt_ref, o_ref,
                            acc_ref):
    k = pl.program_id(0)

    @pl.when(k == 0)
    def _():
        acc_ref[...] = jnp.zeros_like(acc_ref)

    acc_ref[...] += jnp.dot(x_ref[...], w_ref[...],
                            preferred_element_type=jnp.float32)

    @pl.when(k == pl.num_programs(0) - 1)
    def _():
        h = jnp.maximum(acc_ref[...] + b_ref[...].astype(jnp.float32), 0.0)
        logits = jnp.dot(h.astype(wt_ref.dtype), wt_ref[...],
                         preferred_element_type=jnp.float32)
        o_ref[...] = (logits + bt_ref[...].astype(jnp.float32)).astype(
            o_ref.dtype)


def linear_relu_top(x, w, b, wt, bt, *, out_dtype=jnp.float32):
    """logits = relu(x @ w + b) @ wt + bt, in one pallas_call.

    Saves a kernel launch and the HBM round trip of the hidden activations;
    wt should be padded to a lane-dense width (multiple of 128).
    """
    M, K = x.shape
    Kw, N = w.shape
    Nt, P = wt.shape
    assert K == Kw and N == Nt and b.shape == (N,) and bt.shape == (P,)
    bk = _pick_block_k(K, N, w.dtype.itemsize, _weight_block_budget_bytes())
    assert K % bk == 0

    return pl.pallas_call(
        _classifier_tail_kernel,
        grid=(K // bk,),
        in_specs=[pl.BlockSpec((M, bk), lambda k: (0, k)),
                  pl.BlockSpec((bk, N), lambda k: (k, 0)),
                  pl.BlockSpec((1, N), lambda k: (0, 0)),
                  pl.BlockSpec((N, P), lambda k: (0, 0)),
                  pl.BlockSpec((1, P), lambda k: (0, 0))],
        out_specs=pl.BlockSpec((M, P), lambda k: (0, 0)),
        out_shape=jax.ShapeDtypeStruct((M, P), out_dtype),
        scratch_shapes=[pltpu.VMEM((M, N), jnp.float32)],
        compiler_params=pltpu.CompilerParams(
            dimension_semantics=("arbitrary",),
            vmem_limit_bytes=_vmem_limit_bytes()),
        cost_estimate=pl.CostEstimate(
            flops=2 * M * K * N + 2 * M * N * P,
            transcendentals=0,
            bytes_accessed=K * N * w.dtype.itemsize
                           + N * P * wt.dtype.itemsize
                           + M * K * x.dtype.itemsize
                           + M * P * jnp.dtype(out_dtype).itemsize),
    )(x, w, b.reshape(1, N), wt, bt.reshape(1, P))


# ---------------------------------------------------------------------------
# SPPNet head: weight prep + forward
# ---------------------------------------------------------------------------
def prepare_params(w1, b1, w2, b2, w3, b3, C,
                   out_pool_size=OUT_POOL_SIZE, compute_dtype=jnp.bfloat16):
    """One-time host-side weight preparation:
      * permute w1 rows so the first Linear consumes the SPP kernel's
        flattening directly (no per-level transpose/reshape/concat at runtime),
      * cast matmul weights to bf16 (weight streaming dominates at small M),
      * pad the tiny top_layer to a lane-dense 128-wide output.
    Biases stay f32 (added on the f32 accumulator)."""
    perm = _spp_col_permutation(C, out_pool_size)
    num_classes = int(w3.shape[1])
    pad = (-num_classes) % 128
    return {
        "w1": jnp.asarray(w1)[perm, :].astype(compute_dtype),
        "b1": jnp.asarray(b1, jnp.float32),
        "w2": jnp.asarray(w2).astype(compute_dtype),
        "b2": jnp.asarray(b2, jnp.float32),
        "w3": jnp.pad(jnp.asarray(w3), ((0, 0), (0, pad))).astype(compute_dtype),
        "b3": jnp.pad(jnp.asarray(b3, jnp.float32), ((0, pad),)),
        "num_classes": num_classes,
    }


def sppnet_head_forward(feat_nlc, params, out_pool_size=OUT_POOL_SIZE):
    """SPPNet forward after the conv backbone: SPP -> classifier -> top_layer.

    feat_nlc: (N, L, C) channels-last feature map.  nn.Dropout is identity at
    inference time (no-op here).  Returns (N, num_classes) f32 logits.
    """
    spp = spp_1d(feat_nlc, out_pool_size, out_dtype=params["w1"].dtype)
    h1 = linear(spp, params["w1"], params["b1"], apply_relu=True,
                out_dtype=params["w2"].dtype)
    logits = linear_relu_top(h1, params["w2"], params["b2"],
                             params["w3"], params["b3"],
                             out_dtype=jnp.float32)
    return logits[:, :params["num_classes"]]


# ---------------------------------------------------------------------------
# Pure-JAX references (PyTorch layout / order, f32)
# ---------------------------------------------------------------------------
def _reference_spp(feat_ncl, out_pool_size):
    N, C, L = feat_ncl.shape
    pieces = []
    for s in out_pool_size:
        wid = int(math.ceil(L / s))
        pad = wid * s - L
        xp = jnp.pad(feat_ncl, ((0, 0), (0, 0), (0, pad)))
        pooled = jnp.max(xp.reshape(N, C, s, wid), axis=-1)
        pieces.append(pooled.reshape(N, -1))
    return jnp.concatenate(pieces, axis=1)


def _reference_forward(feat_ncl, params, out_pool_size):
    spp = _reference_spp(feat_ncl, out_pool_size)
    h = jnp.maximum(spp @ params["w1"] + params["b1"], 0.0)
    h = jnp.maximum(h @ params["w2"] + params["b2"], 0.0)
    return h @ params["w3"] + params["b3"]


if __name__ == "__main__":
    # Small demo shapes consistent with the module (real net uses C=256,
    # hidden=2048); L=20 exercises full, partial and all-padding windows.
    N, C, L = 8, 128, 20
    hidden, num_classes = 256, 10
    S = sum(OUT_POOL_SIZE)
    in_features = C * S                     # 128 * 44 = 5632

    key = jax.random.PRNGKey(0)
    k_x, k1, k2, k3, kb1, kb2, kb3 = jax.random.split(key, 7)
    # Channels-last feature map (what the injected conv backbone should emit).
    feat_nlc = jax.random.normal(k_x, (N, L, C), dtype=jnp.float32)
    feat_ncl = jnp.transpose(feat_nlc, (0, 2, 1))   # PyTorch layout, ref only

    w1 = 0.01 * jax.random.normal(k1, (in_features, hidden), jnp.float32)
    b1 = 0.01 * jax.random.normal(kb1, (hidden,), jnp.float32)
    w2 = 0.01 * jax.random.normal(k2, (hidden, hidden), jnp.float32)
    b2 = 0.01 * jax.random.normal(kb2, (hidden,), jnp.float32)
    w3 = 0.01 * jax.random.normal(k3, (hidden, num_classes), jnp.float32)
    b3 = 0.01 * jax.random.normal(kb3, (num_classes,), jnp.float32)

    # SPP kernel alone (f32, exact check vs the PyTorch-order reference).
    spp = jax.block_until_ready(spp_1d(feat_nlc, OUT_POOL_SIZE))
    perm = _spp_col_permutation(C, OUT_POOL_SIZE)
    spp_ref = _reference_spp(feat_ncl, OUT_POOL_SIZE)
    assert spp.shape == (N, in_features), spp.shape
    assert jnp.allclose(spp, spp_ref[:, perm], atol=1e-6), "SPP mismatch"

    # Full post-backbone forward: SPP -> Linear/ReLU -> fused Linear/ReLU+top.
    params_f32 = {"w1": w1, "b1": b1, "w2": w2, "b2": b2, "w3": w3, "b3": b3}
    prepared = prepare_params(w1, b1, w2, b2, w3, b3, C, OUT_POOL_SIZE)
    out = jax.block_until_ready(sppnet_head_forward(feat_nlc, prepared))
    out_ref = _reference_forward(feat_ncl, params_f32, OUT_POOL_SIZE)
    assert out.shape == (N, num_classes), out.shape
    assert jnp.allclose(out, out_ref, atol=2e-2, rtol=2e-2), "forward mismatch"

    print("KERNEL_OK")
</pallas_src>

<mosaic_0001>
module attributes {stable_mosaic.version = 11 : i64} {
  func.func @_spp_kernel(%arg0: i32, %arg1: memref<4x20x128xf32, #tpu.memory_space<vmem>>, %arg2: memref<4x44x128xf32, #tpu.memory_space<vmem>>) attributes {dimension_semantics = [#tpu.dimension_semantics<parallel>], iteration_bounds = array<i64: 2>, scalar_prefetch = 0 : i64, scratch_operands = 0 : i64, tpu.core_type = #tpu.core_type<tc>, window_params = [{transform_indices = @transform_0, window_bounds = array<i64: 4, 20, 128>}, {transform_indices = @transform_1, window_bounds = array<i64: 4, 44, 128>}]} {
    %c0 = arith.constant 0 : index
    %c0_0 = arith.constant 0 : index
    %c0_1 = arith.constant 0 : index
    %0 = vector.load %arg1[%c0, %c0_0, %c0_1] : memref<4x20x128xf32, #tpu.memory_space<vmem>>, vector<4x1x128xf32>
    %c0_2 = arith.constant 0 : index
    %c1 = arith.constant 1 : index
    %c0_3 = arith.constant 0 : index
    %1 = vector.load %arg1[%c0_2, %c1, %c0_3] : memref<4x20x128xf32, #tpu.memory_space<vmem>>, vector<4x1x128xf32>
    %c0_4 = arith.constant 0 : index
    %c2 = arith.constant 2 : index
    %c0_5 = arith.constant 0 : index
    %2 = vector.load %arg1[%c0_4, %c2, %c0_5] : memref<4x20x128xf32, #tpu.memory_space<vmem>>, vector<4x1x128xf32>
    %c0_6 = arith.constant 0 : index
    %c3 = arith.constant 3 : index
    %c0_7 = arith.constant 0 : index
    %3 = vector.load %arg1[%c0_6, %c3, %c0_7] : memref<4x20x128xf32, #tpu.memory_space<vmem>>, vector<4x1x128xf32>
    %c0_8 = arith.constant 0 : index
    %c4 = arith.constant 4 : index
    %c0_9 = arith.constant 0 : index
    %4 = vector.load %arg1[%c0_8, %c4, %c0_9] : memref<4x20x128xf32, #tpu.memory_space<vmem>>, vector<4x1x128xf32>
    %c0_10 = arith.constant 0 : index
    %c5 = arith.constant 5 : index
    %c0_11 = arith.constant 0 : index
    %5 = vector.load %arg1[%c0_10, %c5, %c0_11] : memref<4x20x128xf32, #tpu.memory_space<vmem>>, vector<4x1x128xf32>
    %c0_12 = arith.constant 0 : index
    %c6 = arith.constant 6 : index
    %c0_13 = arith.constant 0 : index
    %6 = vector.load %arg1[%c0_12, %c6, %c0_13] : memref<4x20x128xf32, #tpu.memory_space<vmem>>, vector<4x1x128xf32>
    %c0_14 = arith.constant 0 : index
    %c7 = arith.constant 7 : index
    %c0_15 = arith.constant 0 : index
    %7 = vector.load %arg1[%c0_14, %c7, %c0_15] : memref<4x20x128xf32, #tpu.memory_space<vmem>>, vector<4x1x128xf32>
    %c0_16 = arith.constant 0 : index
    %c8 = arith.constant 8 : index
    %c0_17 = arith.constant 0 : index
    %8 = vector.load %arg1[%c0_16, %c8, %c0_17] : memref<4x20x128xf32, #tpu.memory_space<vmem>>, vector<4x1x128xf32>
    %c0_18 = arith.constant 0 : index
    %c9 = arith.constant 9 : index
    %c0_19 = arith.constant 0 : index
    %9 = vector.load %arg1[%c0_18, %c9, %c0_19] : memref<4x20x128xf32, #tpu.memory_space<vmem>>, vector<4x1x128xf32>
    %c0_20 = arith.constant 0 : index
    %c10 = arith.constant 10 : index
    %c0_21 = arith.constant 0 : index
    %10 = vector.load %arg1[%c0_20, %c10, %c0_21] : memref<4x20x128xf32, #tpu.memory_space<vmem>>, vector<4x1x128xf32>
    %c0_22 = arith.constant 0 : index
    %c11 = arith.constant 11 : index
    %c0_23 = arith.constant 0 : index
    %11 = vector.load %arg1[%c0_22, %c11, %c0_23] : memref<4x20x128xf32, #tpu.memory_space<vmem>>, vector<4x1x128xf32>
    %c0_24 = arith.constant 0 : index
    %c12 = arith.constant 12 : index
    %c0_25 = arith.constant 0 : index
    %12 = vector.load %arg1[%c0_24, %c12, %c0_25] : memref<4x20x128xf32, #tpu.memory_space<vmem>>, vector<4x1x128xf32>
    %c0_26 = arith.constant 0 : index
    %c13 = arith.constant 13 : index
    %c0_27 = arith.constant 0 : index
    %13 = vector.load %arg1[%c0_26, %c13, %c0_27] : memref<4x20x128xf32, #tpu.memory_space<vmem>>, vector<4x1x128xf32>
    %c0_28 = arith.constant 0 : index
    %c14 = arith.constant 14 : index
    %c0_29 = arith.constant 0 : index
    %14 = vector.load %arg1[%c0_28, %c14, %c0_29] : memref<4x20x128xf32, #tpu.memory_space<vmem>>, vector<4x1x128xf32>
    %c0_30 = arith.constant 0 : index
    %c15 = arith.constant 15 : index
    %c0_31 = arith.constant 0 : index
    %15 = vector.load %arg1[%c0_30, %c15, %c0_31] : memref<4x20x128xf32, #tpu.memory_space<vmem>>, vector<4x1x128xf32>
    %c0_32 = arith.constant 0 : index
    %c16 = arith.constant 16 : index
    %c0_33 = arith.constant 0 : index
    %16 = vector.load %arg1[%c0_32, %c16, %c0_33] : memref<4x20x128xf32, #tpu.memory_space<vmem>>, vector<4x1x128xf32>
    %c0_34 = arith.constant 0 : index
    %c17 = arith.constant 17 : index
    %c0_35 = arith.constant 0 : index
    %17 = vector.load %arg1[%c0_34, %c17, %c0_35] : memref<4x20x128xf32, #tpu.memory_space<vmem>>, vector<4x1x128xf32>
    %c0_36 = arith.constant 0 : index
    %c18 = arith.constant 18 : index
    %c0_37 = arith.constant 0 : index
    %18 = vector.load %arg1[%c0_36, %c18, %c0_37] : memref<4x20x128xf32, #tpu.memory_space<vmem>>, vector<4x1x128xf32>
    %c0_38 = arith.constant 0 : index
    %c19 = arith.constant 19 : index
    %c0_39 = arith.constant 0 : index
    %19 = vector.load %arg1[%c0_38, %c19, %c0_39] : memref<4x20x128xf32, #tpu.memory_space<vmem>>, vector<4x1x128xf32>
    %20 = arith.maximumf %0, %1 : vector<4x1x128xf32>
    %21 = arith.maximumf %2, %3 : vector<4x1x128xf32>
    %22 = arith.maximumf %4, %5 : vector<4x1x128xf32>
    %23 = arith.maximumf %6, %7 : vector<4x1x128xf32>
    %24 = arith.maximumf %8, %9 : vector<4x1x128xf32>
    %25 = arith.maximumf %10, %11 : vector<4x1x128xf32>
    %26 = arith.maximumf %12, %13 : vector<4x1x128xf32>
    %27 = arith.maximumf %14, %15 : vector<4x1x128xf32>
    %28 = arith.maximumf %16, %17 : vector<4x1x128xf32>
    %29 = arith.maximumf %18, %19 : vector<4x1x128xf32>
    %30 = arith.maximumf %20, %21 : vector<4x1x128xf32>
    %31 = arith.maximumf %22, %23 : vector<4x1x128xf32>
    %32 = arith.maximumf %24, %25 : vector<4x1x128xf32>
    %33 = arith.maximumf %26, %27 : vector<4x1x128xf32>
    %34 = arith.maximumf %28, %29 : vector<4x1x128xf32>
    %35 = arith.maximumf %30, %31 : vector<4x1x128xf32>
    %36 = arith.maximumf %32, %33 : vector<4x1x128xf32>
    %37 = arith.maximumf %35, %36 : vector<4x1x128xf32>
    %38 = arith.maximumf %37, %34 : vector<4x1x128xf32>
    %c0_40 = arith.constant 0 : index
    %c0_41 = arith.constant 0 : index
    %c0_42 = arith.constant 0 : index
    %39 = vector.load %arg2[%c0_40, %c0_41, %c0_42] : memref<4x44x128xf32, #tpu.memory_space<vmem>>, vector<4x1x128xf32>
    tpu.vector_store %arg2[%c0_40, %c0_41, %c0_42], %38 {strides = array<i32>} : memref<4x44x128xf32, #tpu.memory_space<vmem>>, vector<4x1x128xf32>,
    %c0_43 = arith.constant 0 : index
    %c0_44 = arith.constant 0 : index
    %c0_45 = arith.constant 0 : index
    %40 = tpu.strided_load %arg1[%c0_43, %c0_44, %c0_45] {strides = array<i32: 1, 7, 1>} : memref<4x20x128xf32, #tpu.memory_space<vmem>>, vector<4x2x128xf32>
    %c0_46 = arith.constant 0 : index
    %c1_47 = arith.constant 1 : index
    %c0_48 = arith.constant 0 : index
    %41 = tpu.strided_load %arg1[%c0_46, %c1_47, %c0_48] {strides = array<i32: 1, 7, 1>} : memref<4x20x128xf32, #tpu.memory_space<vmem>>, vector<4x2x128xf32>
    %c0_49 = arith.constant 0 : index
    %c2_50 = arith.constant 2 : index
    %c0_51 = arith.constant 0 : index
    %42 = tpu.strided_load %arg1[%c0_49, %c2_50, %c0_51] {strides = array<i32: 1, 7, 1>} : memref<4x20x128xf32, #tpu.memory_space<vmem>>, vector<4x2x128xf32>
    %c0_52 = arith.constant 0 : index
    %c3_53 = arith.constant 3 : index
    %c0_54 = arith.constant 0 : index
    %43 = tpu.strided_load %arg1[%c0_52, %c3_53, %c0_54] {strides = array<i32: 1, 7, 1>} : memref<4x20x128xf32, #tpu.memory_space<vmem>>, vector<4x2x128xf32>
    %c0_55 = arith.constant 0 : index
    %c4_56 = arith.constant 4 : index
    %c0_57 = arith.constant 0 : index
    %44 = tpu.strided_load %arg1[%c0_55, %c4_56, %c0_57] {strides = array<i32: 1, 7, 1>} : memref<4x20x128xf32, #tpu.memory_space<vmem>>, vector<4x2x128xf32>
    %c0_58 = arith.constant 0 : index
    %c5_59 = arith.constant 5 : index
    %c0_60 = arith.constant 0 : index
    %45 = tpu.strided_load %arg1[%c0_58, %c5_59, %c0_60] {strides = array<i32: 1, 7, 1>} : memref<4x20x128xf32, #tpu.memory_space<vmem>>, vector<4x2x128xf32>
    %c0_61 = arith.constant 0 : index
    %c6_62 = arith.constant 6 : index
    %c0_63 = arith.constant 0 : index
    %46 = tpu.strided_load %arg1[%c0_61, %c6_62, %c0_63] {strides = array<i32: 1, 7, 1>} : memref<4x20x128xf32, #tpu.memory_space<vmem>>, vector<4x2x128xf32>
    %47 = arith.maximumf %40, %41 : vector<4x2x128xf32>
    %48 = arith.maximumf %42, %43 : vector<4x2x128xf32>
    %49 = arith.maximumf %44, %45 : vector<4x2x128xf32>
    %50 = arith.maximumf %47, %48 : vector<4x2x128xf32>
    %51 = arith.maximumf %49, %46 : vector<4x2x128xf32>
    %52 = arith.maximumf %50, %51 : vector<4x2x128xf32>
    %c0_64 = arith.constant 0 : index
    %c1_65 = arith.constant 1 : index
    %c0_66 = arith.constant 0 : index
    %53 = vector.load %arg2[%c0_64, %c1_65, %c0_66] : memref<4x44x128xf32, #tpu.memory_space<vmem>>, vector<4x2x128xf32>
    tpu.vector_store %arg2[%c0_64, %c1_65, %c0_66], %52 {strides = array<i32>} : memref<4x44x128xf32, #tpu.memory_space<vmem>>, vector<4x2x128xf32>,
    %c0_67 = arith.constant 0 : index
    %c14_68 = arith.constant 14 : index
    %c0_69 = arith.constant 0 : index
    %54 = vector.load %arg1[%c0_67, %c14_68, %c0_69] : memref<4x20x128xf32, #tpu.memory_space<vmem>>, vector<4x1x128xf32>
    %c0_70 = arith.constant 0 : index
    %c15_71 = arith.constant 15 : index
    %c0_72 = arith.constant 0 : index
    %55 = vector.load %arg1[%c0_70, %c15_71, %c0_72] : memref<4x20x128xf32, #tpu.memory_space<vmem>>, vector<4x1x128xf32>
    %c0_73 = arith.constant 0 : index
    %c16_74 = arith.constant 16 : index
    %c0_75 = arith.constant 0 : index
    %56 = vector.load %arg1[%c0_73, %c16_74, %c0_75] : memref<4x20x128xf32, #tpu.memory_space<vmem>>, vector<4x1x128xf32>
    %c0_76 = arith.constant 0 : index
    %c17_77 = arith.constant 17 : index
    %c0_78 = arith.constant 0 : index
    %57 = vector.load %arg1[%c0_76, %c17_77, %c0_78] : memref<4x20x128xf32, #tpu.memory_space<vmem>>, vector<4x1x128xf32>
    %c0_79 = arith.constant 0 : index
    %c18_80 = arith.constant 18 : index
    %c0_81 = arith.constant 0 : index
    %58 = vector.load %arg1[%c0_79, %c18_80, %c0_81] : memref<4x20x128xf32, #tpu.memory_space<vmem>>, vector<4x1x128xf32>
    %c0_82 = arith.constant 0 : index
    %c19_83 = arith.constant 19 : index
    %c0_84 = arith.constant 0 : index
    %59 = vector.load %arg1[%c0_82, %c19_83, %c0_84] : memref<4x20x128xf32, #tpu.memory_space<vmem>>, vector<4x1x128xf32>
    %60 = arith.maximumf %54, %55 : vector<4x1x128xf32>
    %61 = arith.maximumf %56, %57 : vector<4x1x128xf32>
    %62 = arith.maximumf %58, %59 : vector<4x1x128xf32>
    %63 = arith.maximumf %60, %61 : vector<4x1x128xf32>
    %64 = arith.maximumf %63, %62 : vector<4x1x128xf32>
    %cst = arith.constant 0.000000e+00 : f32
    %65 = vector.broadcast %cst : f32 to vector<4x1x128xf32>
    %66 = arith.maximumf %64, %65 : vector<4x1x128xf32>
    %c0_85 = arith.constant 0 : index
    %c3_86 = arith.constant 3 : index
    %c0_87 = arith.constant 0 : index
    %67 = vector.load %arg2[%c0_85, %c3_86, %c0_87] : memref<4x44x128xf32, #tpu.memory_space<vmem>>, vector<4x1x128xf32>
    tpu.vector_store %arg2[%c0_85, %c3_86, %c0_87], %66 {strides = array<i32>} : memref<4x44x128xf32, #tpu.memory_space<vmem>>, vector<4x1x128xf32>,
    %c0_88 = arith.constant 0 : index
    %c0_89 = arith.constant 0 : index
    %c0_90 = arith.constant 0 : index
    %68 = tpu.strided_load %arg1[%c0_88, %c0_89, %c0_90] {strides = array<i32: 1, 4, 1>} : memref<4x20x128xf32, #tpu.memory_space<vmem>>, vector<4x5x128xf32>
    %c0_91 = arith.constant 0 : index
    %c1_92 = arith.constant 1 : index
    %c0_93 = arith.constant 0 : index
    %69 = tpu.strided_load %arg1[%c0_91, %c1_92, %c0_93] {strides = array<i32: 1, 4, 1>} : memref<4x20x128xf32, #tpu.memory_space<vmem>>, vector<4x5x128xf32>
    %c0_94 = arith.constant 0 : index
    %c2_95 = arith.constant 2 : index
    %c0_96 = arith.constant 0 : index
    %70 = tpu.strided_load %arg1[%c0_94, %c2_95, %c0_96] {strides = array<i32: 1, 4, 1>} : memref<4x20x128xf32, #tpu.memory_space<vmem>>, vector<4x5x128xf32>
    %c0_97 = arith.constant 0 : index
    %c3_98 = arith.constant 3 : index
    %c0_99 = arith.constant 0 : index
    %71 = tpu.strided_load %arg1[%c0_97, %c3_98, %c0_99] {strides = array<i32: 1, 4, 1>} : memref<4x20x128xf32, #tpu.memory_space<vmem>>, vector<4x5x128xf32>
    %72 = arith.maximumf %68, %69 : vector<4x5x128xf32>
    %73 = arith.maximumf %70, %71 : vector<4x5x128xf32>
    %74 = arith.maximumf %72, %73 : vector<4x5x128xf32>
    %c0_100 = arith.constant 0 : index
    %c4_101 = arith.constant 4 : index
    %c0_102 = arith.constant 0 : index
    %75 = vector.load %arg2[%c0_100, %c4_101, %c0_102] : memref<4x44x128xf32, #tpu.memory_space<vmem>>, vector<4x5x128xf32>
    tpu.vector_store %arg2[%c0_100, %c4_101, %c0_102], %74 {strides = array<i32>} : memref<4x44x128xf32, #tpu.memory_space<vmem>>, vector<4x5x128xf32>,
    %cst_103 = arith.constant 0.000000e+00 : f32
    %76 = vector.broadcast %cst_103 : f32 to vector<4x1x128xf32>
    %c0_104 = arith.constant 0 : index
    %c9_105 = arith.constant 9 : index
    %c0_106 = arith.constant 0 : index
    %77 = vector.load %arg2[%c0_104, %c9_105, %c0_106] : memref<4x44x128xf32, #tpu.memory_space<vmem>>, vector<4x1x128xf32>
    tpu.vector_store %arg2[%c0_104, %c9_105, %c0_106], %76 {strides = array<i32>} : memref<4x44x128xf32, #tpu.memory_space<vmem>>, vector<4x1x128xf32>,
    %c0_107 = arith.constant 0 : index
    %c0_108 = arith.constant 0 : index
    %c0_109 = arith.constant 0 : index
    %78 = tpu.strided_load %arg1[%c0_107, %c0_108, %c0_109] {strides = array<i32: 1, 3, 1>} : memref<4x20x128xf32, #tpu.memory_space<vmem>>, vector<4x6x128xf32>
    %c0_110 = arith.constant 0 : index
    %c1_111 = arith.constant 1 : index
    %c0_112 = arith.constant 0 : index
    %79 = tpu.strided_load %arg1[%c0_110, %c1_111, %c0_112] {strides = array<i32: 1, 3, 1>} : memref<4x20x128xf32, #tpu.memory_space<vmem>>, vector<4x6x128xf32>
    %c0_113 = arith.constant 0 : index
    %c2_114 = arith.constant 2 : index
    %c0_115 = arith.constant 0 : index
    %80 = tpu.strided_load %arg1[%c0_113, %c2_114, %c0_115] {strides = array<i32: 1, 3, 1>} : memref<4x20x128xf32, #tpu.memory_space<vmem>>, vector<4x6x128xf32>
    %81 = arith.maximumf %78, %79 : vector<4x6x128xf32>
    %82 = arith.maximumf %81, %80 : vector<4x6x128xf32>
    %c0_116 = arith.constant 0 : index
    %c10_117 = arith.constant 10 : index
    %c0_118 = arith.constant 0 : index
    %83 = vector.load %arg2[%c0_116, %c10_117, %c0_118] : memref<4x44x128xf32, #tpu.memory_space<vmem>>, vector<4x6x128xf32>
    tpu.vector_store %arg2[%c0_116, %c10_117, %c0_118], %82 {strides = array<i32>} : memref<4x44x128xf32, #tpu.memory_space<vmem>>, vector<4x6x128xf32>,
    %c0_119 = arith.constant 0 : index
    %c18_120 = arith.constant 18 : index
    %c0_121 = arith.constant 0 : index
    %84 = vector.load %arg1[%c0_119, %c18_120, %c0_121] : memref<4x20x128xf32, #tpu.memory_space<vmem>>, vector<4x1x128xf32>
    %c0_122 = arith.constant 0 : index
    %c19_123 = arith.constant 19 : index
    %c0_124 = arith.constant 0 : index
    %85 = vector.load %arg1[%c0_122, %c19_123, %c0_124] : memref<4x20x128xf32, #tpu.memory_space<vmem>>, vector<4x1x128xf32>
    %86 = arith.maximumf %84, %85 : vector<4x1x128xf32>
    %cst_125 = arith.constant 0.000000e+00 : f32
    %87 = vector.broadcast %cst_125 : f32 to vector<4x1x128xf32>
    %88 = arith.maximumf %86, %87 : vector<4x1x128xf32>
    %c0_126 = arith.constant 0 : index
    %c16_127 = arith.constant 16 : index
    %c0_128 = arith.constant 0 : index
    %89 = vector.load %arg2[%c0_126, %c16_127, %c0_128] : memref<4x44x128xf32, #tpu.memory_space<vmem>>, vector<4x1x128xf32>
    tpu.vector_store %arg2[%c0_126, %c16_127, %c0_128], %88 {strides = array<i32>} : memref<4x44x128xf32, #tpu.memory_space<vmem>>, vector<4x1x128xf32>,
    %cst_129 = arith.constant 0.000000e+00 : f32
    %90 = vector.broadcast %cst_129 : f32 to vector<4x1x128xf32>
    %c0_130 = arith.constant 0 : index
    %c17_131 = arith.constant 17 : index
    %c0_132 = arith.constant 0 : index
    %91 = vector.load %arg2[%c0_130, %c17_131, %c0_132] : memref<4x44x128xf32, #tpu.memory_space<vmem>>, vector<4x1x128xf32>
    tpu.vector_store %arg2[%c0_130, %c17_131, %c0_132], %90 {strides = array<i32>} : memref<4x44x128xf32, #tpu.memory_space<vmem>>, vector<4x1x128xf32>,
    %c0_133 = arith.constant 0 : index
    %c0_134 = arith.constant 0 : index
    %c0_135 = arith.constant 0 : index
    %92 = tpu.strided_load %arg1[%c0_133, %c0_134, %c0_135] {strides = array<i32: 1, 2, 1>} : memref<4x20x128xf32, #tpu.memory_space<vmem>>, vector<4x10x128xf32>
    %c0_136 = arith.constant 0 : index
    %c1_137 = arith.constant 1 : index
    %c0_138 = arith.constant 0 : index
    %93 = tpu.strided_load %arg1[%c0_136, %c1_137, %c0_138] {strides = array<i32: 1, 2, 1>} : memref<4x20x128xf32, #tpu.memory_space<vmem>>, vector<4x10x128xf32>
    %94 = arith.maximumf %92, %93 : vector<4x10x128xf32>
    %c0_139 = arith.constant 0 : index
    %c18_140 = arith.constant 18 : index
    %c0_141 = arith.constant 0 : index
    %95 = vector.load %arg2[%c0_139, %c18_140, %c0_141] : memref<4x44x128xf32, #tpu.memory_space<vmem>>, vector<4x10x128xf32>
    tpu.vector_store %arg2[%c0_139, %c18_140, %c0_141], %94 {strides = array<i32>} : memref<4x44x128xf32, #tpu.memory_space<vmem>>, vector<4x10x128xf32>,
    %c0_142 = arith.constant 0 : index
    %c0_143 = arith.constant 0 : index
    %c0_144 = arith.constant 0 : index
    %96 = tpu.strided_load %arg1[%c0_142, %c0_143, %c0_144] {strides = array<i32: 1, 2, 1>} : memref<4x20x128xf32, #tpu.memory_space<vmem>>, vector<4x10x128xf32>
    %c0_145 = arith.constant 0 : index
    %c1_146 = arith.constant 1 : index
    %c0_147 = arith.constant 0 : index
    %97 = tpu.strided_load %arg1[%c0_145, %c1_146, %c0_147] {strides = array<i32: 1, 2, 1>} : memref<4x20x128xf32, #tpu.memory_space<vmem>>, vector<4x10x128xf32>
    %98 = arith.maximumf %96, %97 : vector<4x10x128xf32>
    %c0_148 = arith.constant 0 : index
    %c28 = arith.constant 28 : index
    %c0_149 = arith.constant 0 : index
    %99 = vector.load %arg2[%c0_148, %c28, %c0_149] : memref<4x44x128xf32, #tpu.memory_space<vmem>>, vector<4x10x128xf32>
    tpu.vector_store %arg2[%c0_148, %c28, %c0_149], %98 {strides = array<i32>} : memref<4x44x128xf32, #tpu.memory_space<vmem>>, vector<4x10x128xf32>,
    %cst_150 = arith.constant 0.000000e+00 : f32
    %100 = vector.broadcast %cst_150 : f32 to vector<4x6x128xf32>
    %c0_151 = arith.constant 0 : index
    %c38 = arith.constant 38 : index
    %c0_152 = arith.constant 0 : index
    %101 = vector.load %arg2[%c0_151, %c38, %c0_152] : memref<4x44x128xf32, #tpu.memory_space<vmem>>, vector<4x6x128xf32>
    tpu.vector_store %arg2[%c0_151, %c38, %c0_152], %100 {strides = array<i32>} : memref<4x44x128xf32, #tpu.memory_space<vmem>>, vector<4x6x128xf32>,
    return
  }
  func.func @transform_0(%arg0: i32) -> (i32, i32, i32) {
    %c0_i32 = arith.constant 0 : i32
    %c0_i32_0 = arith.constant 0 : i32
    %c0_i32_1 = arith.constant 0 : i32
    return %arg0, %c0_i32, %c0_i32_0 : i32, i32, i32
  }
  func.func @transform_1(%arg0: i32) -> (i32, i32, i32) {
    %c0_i32 = arith.constant 0 : i32
    %c0_i32_0 = arith.constant 0 : i32
    %c0_i32_1 = arith.constant 0 : i32
    return %arg0, %c0_i32, %c0_i32_0 : i32, i32, i32
  }
}

</mosaic_0001>

<bundles_post_ra>
// kernel: tpu_custom_call.1
= control target key start
LH: loop header
LB: loop body
LE: loop exit
PB: predicated region body
PF: predicated region fallthrough
CT: control target
= control target key end

     0   :  { %s769_s6 = smov 0   ;;  %s1042_s0 = inlined_call_operand.vmem [shape: f32[8,20,128], index: 0, kind: input, shape index: {}]   ;;  %s1043_s1 = inlined_call_operand.vmem [shape: f32[8,44,128], index: 1, kind: output, shape index: {}]  }
   0x1 LB: > { %s645_s7 = sadd.s32 4294967295, %s756_s6   ;;  %p649_p0 = scmp.ge.s32.totalorder %s756_s6, 1  ;;  %s756_s6 = sphi %s769_s6, %s11_s6  }
   0x2   : > { %p89_p1 = scmp.lt.s32.totalorder %s756_s6, 3 }
   0x4   : > { %p90_p2 = pnand %p649_p0, %p89_p1 }
   0x5   : > { %s650_s8 = sshll.u32 (!%p90_p2), %s645_s7, 2  ;;  %v758_v7 = vmov (!%p90_p2), 0.0  }
   0x6   : > { %93 = sbr.rel (%p90_p2) target bundleno = 119 (0x77), region = 24  ;;  %p112_p3 = scmp.lt.s32.totalorder (!%p90_p2), %s650_s8, 7 }
   0xd   : > { %s1045_s8 = smov (!%p112_p3, %s650_s8), 7 }
   0xe   : > { %s739_s9 = smul.u32 24, %s1045_s8 }
   0xf   : > { %s740_s10 = smul.u32 48, %s1045_s8 }
  0x10   : > { %s780_s13 = scalar_lea.vmem %s1042_s0, %s739_s9 }
  0x11   : > { %s785_s16 = scalar_lea.vmem %s1043_s1, %s740_s10  ;;  %v125_v0 = vld [vmem:[%s780_s13] sm:$0x1]  ;;  %v129_v1 = vld [vmem:[%s780_s13 + $0x1] sm:$0x1]  ;;  %v133_v2 = vld [vmem:[%s780_s13 + $0x2] sm:$0x1] }
  0x12   : > { %v137_v3 = vld [vmem:[%s780_s13 + $0x3] sm:$0x1]  ;;  %v141_v4 = vld [vmem:[%s780_s13 + $0x4] sm:$0x1]  ;;  %v145_v5 = vld [vmem:[%s780_s13 + $0x5] sm:$0x1]  ;;  %v205_v6 = vmax.f32 %v125_v0, %v129_v1 }
  0x13   : > { %455 = vst [vmem:[%s785_s16 + $0x9] sm:$0x1] %v758_v7  ;;  %507 = vst [vmem:[%s785_s16 + $0x11] sm:$0x1] %v758_v7  ;;  %v149_v8 = vld [vmem:[%s780_s13 + $0x6] sm:$0x1]  ;;  %v209_v11 = vmax.f32 %v133_v2, %v137_v3  ;;  %v213_v12 = vmax.f32 %v141_v4, %v145_v5 }
  0x14   : > { %583 = vst [vmem:[%s785_s16 + $0x26] sm:$0x3f] %v758_v7  ;;  %v153_v9 = vld [vmem:[%s780_s13 + $0x7] sm:$0x1]  ;;  %v157_v10 = vld [vmem:[%s780_s13 + $0x8] sm:$0x1] }
  0x15   : > { %456 = vst [vmem:[%s785_s16 + $0x39] sm:$0x1] %v758_v7  ;;  %508 = vst [vmem:[%s785_s16 + $0x41] sm:$0x1] %v758_v7  ;;  %v161_v13 = vld [vmem:[%s780_s13 + $0x9] sm:$0x1]  ;;  %v217_v16 = vmax.f32 %v149_v8, %v153_v9  ;;  %v245_v22 = vmax.f32 %v205_v6, %v209_v11 }
  0x16   : > { %584 = vst [vmem:[%s785_s16 + $0x56] sm:$0x3f] %v758_v7  ;;  %v165_v14 = vld [vmem:[%s780_s13 + $0xa] sm:$0x1]  ;;  %v169_v15 = vld [vmem:[%s780_s13 + $0xb] sm:$0x1]  ;;  %v221_v20 = vmax.f32 %v157_v10, %v161_v13 }
  0x17   : > { %457 = vst [vmem:[%s785_s16 + $0x69] sm:$0x1] %v758_v7  ;;  %509 = vst [vmem:[%s785_s16 + $0x71] sm:$0x1] %v758_v7  ;;  %v173_v17 = vld [vmem:[%s780_s13 + $0xc] sm:$0x1]  ;;  %v225_v21 = vmax.f32 %v165_v14, %v169_v15  ;;  %v249_v27 = vmax.f32 %v213_v12, %v217_v16 }
  0x18   : > { %585 = vst [vmem:[%s785_s16 + $0x86] sm:$0x3f] %v758_v7  ;;  %v177_v18 = vld [vmem:[%s780_s13 + $0xd] sm:$0x1]  ;;  %v181_v19 = vld [vmem:[%s780_s13 + $0xe] sm:$0x1] }
  0x19   : > { %458 = vst [vmem:[%s785_s16 + $0x99] sm:$0x1] %v758_v7  ;;  %510 = vst [vmem:[%s785_s16 + $0xa1] sm:$0x1] %v758_v7  ;;  %v185_v23 = vld [vmem:[%s780_s13 + $0xf] sm:$0x1]  ;;  %v229_v26 = vmax.f32 %v173_v17, %v177_v18  ;;  %v253_v32 = vmax.f32 %v221_v20, %v225_v21  ;;  %v265_v38 = vmax.f32 %v245_v22, %v249_v27 }
  0x1a   : > { %586 = vst [vmem:[%s785_s16 + $0xb6] sm:$0x3f] %v758_v7  ;;  %v189_v24 = vld [vmem:[%s780_s13 + $0x10] sm:$0x1]  ;;  %v193_v25 = vld [vmem:[%s780_s13 + $0x11] sm:$0x1]  ;;  %v233_v30 = vmax.f32 %v181_v19, %v185_v23 }
  0x1b   : > { %v197_v28 = vld [vmem:[%s780_s13 + $0x12] sm:$0x1]  ;;  %v201_v29 = vld [vmem:[%s780_s13 + $0x13] sm:$0x1]  ;;  %v237_v31 = vmax.f32 %v189_v24, %v193_v25  ;;  %v368_v33 = vld [vmem:[%s780_s13 + $0xe] sm:$0x1] }
  0x1c   : > { %v241_v34 = vmax.f32 %v197_v28, %v201_v29  ;;  %v285_v35 = vld [vmem:[%s780_s13] ss:$7 sm:$0x3]  ;;  %v657_v36 = vld [vmem:[%s780_s13 + $0x1] ss:$7 sm:$0x3]  ;;  %v257_v37 = vmax.f32 %v229_v26, %v233_v30 }
  0x1d   : > { %v661_v39 = vld [vmem:[%s780_s13 + $0x2] ss:$7 sm:$0x3]  ;;  %v665_v40 = vld [vmem:[%s780_s13 + $0x3] ss:$7 sm:$0x3]  ;;  %v340_v41 = vmax.f32 %v285_v35, %v657_v36 }
  0x1e   : > { %v669_v42 = vld [vmem:[%s780_s13 + $0x4] ss:$7 sm:$0x3]  ;;  %v673_v43 = vld [vmem:[%s780_s13 + $0x5] ss:$7 sm:$0x3]  ;;  %v344_v44 = vmax.f32 %v661_v39, %v665_v40  ;;  %v261_v45 = vmax.f32 %v237_v31, %v241_v34  ;;  %v269_v46 = vmax.f32 %v253_v32, %v257_v37 }
  0x1f   : > { %v677_v47 = vld [vmem:[%s780_s13 + $0x6] ss:$7 sm:$0x3]  ;;  %v348_v48 = vmax.f32 %v669_v42, %v673_v43  ;;  %v372_v49 = vld [vmem:[%s780_s13 + $0xf] sm:$0x1] }
  0x20   : > { %v352_v50 = vmax.f32 %v340_v41, %v344_v44  ;;  %v376_v51 = vld [vmem:[%s780_s13 + $0x10] sm:$0x1]  ;;  %v380_v52 = vld [vmem:[%s780_s13 + $0x11] sm:$0x1]  ;;  %v384_v53 = vld [vmem:[%s780_s13 + $0x12] sm:$0x1]  ;;  %v392_v54 = vmax.f32 %v368_v33, %v372_v49  ;;  %v273_v55 = vmax.f32 %v265_v38, %v269_v46 }
  0x21   : > { %v356_v56 = vmax.f32 %v348_v48, %v677_v47  ;;  %v388_v57 = vld [vmem:[%s780_s13 + $0x13] sm:$0x1]  ;;  %v396_v58 = vmax.f32 %v376_v51, %v380_v52  ;;  %v420_v59 = vld [vmem:[%s780_s13] ss:$4 sm:$0x1f] }
  0x22   : > { %v400_v60 = vmax.f32 %v384_v53, %v388_v57  ;;  %v684_v61 = vld [vmem:[%s780_s13 + $0x1] ss:$4 sm:$0x1f]  ;;  %v688_v62 = vld [vmem:[%s780_s13 + $0x2] ss:$4 sm:$0x1f]  ;;  %v277_v63 = vmax.f32 %v273_v55, %v261_v45 }
  0x23   : > { %v360_v0 = vmax.f32 %v352_v50, %v356_v56  ;;  %v404_v1 = vmax.f32 %v392_v54, %v396_v58  ;;  %v692_v2 = vld [vmem:[%s780_s13 + $0x3] ss:$4 sm:$0x1f]  ;;  %v439_v3 = vmax.f32 %v420_v59, %v684_v61  ;;  %v487_v10 = vld [vmem:[%s780_s13 + $0x12] sm:$0x1] }
  0x24   : > { %v459_v4 = vld [vmem:[%s780_s13] ss:$3 sm:$0x3f]  ;;  %v443_v5 = vmax.f32 %v688_v62, %v692_v2  ;;  %v699_v6 = vld [vmem:[%s780_s13 + $0x1] ss:$3 sm:$0x3f] }
  0x25   : > { %v703_v7 = vld [vmem:[%s780_s13 + $0x2] ss:$3 sm:$0x3f]  ;;  %281 = vst [vmem:[%s785_s16] sm:$0x1] %v277_v63  ;;  %364 = vst [vmem:[%s785_s16 + $0x1] sm:$0x3] %v360_v0  ;;  %v408_v8 = vmax.f32 %v404_v1, %v400_v60  ;;  %v475_v9 = vmax.f32 %v459_v4, %v699_v6 }
  0x26   : > { %v491_v11 = vld [vmem:[%s780_s13 + $0x13] sm:$0x1]  ;;  %v511_v12 = vld [vmem:[%s780_s13] ss:$2 sm:$0xff]  ;;  %v447_v13 = vmax.f32 %v439_v3, %v443_v5  ;;  %v714_v15 = vld [vmem:[%s780_s13 + $0x1] ss:$2 sm:$0xff] }
  0x27   : > { %v495_v14 = vmax.f32 %v487_v10, %v491_v11  ;;  %v707_v16 = vld [vmem:[%s780_s13 + $0x10] ss:$2 sm:$0x3]  ;;  %v412_v17 = vmax.f32 %v408_v8, 0.0  ;;  %v479_v18 = vmax.f32 %v475_v9, %v703_v7  ;;  %v535_v19 = vmax.f32 %v511_v12, %v714_v15  ;;  %v551_v21 = vld [vmem:[%s780_s13] ss:$2 sm:$0xff] }
  0x28   : > { %v715_v20 = vld [vmem:[%s780_s13 + $0x11] ss:$2 sm:$0x3]  ;;  %451 = vst [vmem:[%s785_s16 + $0x4] sm:$0x1f] %v447_v13 }
  0x29   : > { %v499_v22 = vmax.f32 %v495_v14, 0.0  ;;  %v536_v23 = vmax.f32 %v707_v16, %v715_v20  ;;  %v729_v24 = vld [vmem:[%s780_s13 + $0x1] ss:$2 sm:$0xff]  ;;  %v722_v25 = vld [vmem:[%s780_s13 + $0x10] ss:$2 sm:$0x3] }
  0x2a   : > { %416 = vst [vmem:[%s785_s16 + $0x3] sm:$0x1] %v412_v17  ;;  %483 = vst [vmem:[%s785_s16 + $0xa] sm:$0x3f] %v479_v18  ;;  %v567_v26 = vmax.f32 %v551_v21, %v729_v24  ;;  %v126_v28 = vld [vmem:[%s780_s13 + $0x18] sm:$0x1] }
  0x2b   : > { %543 = vst [vmem:[%s785_s16 + $0x12] sm:$0xff] %v535_v19  ;;  %v730_v27 = vld [vmem:[%s780_s13 + $0x11] ss:$2 sm:$0x3]  ;;  %503 = vst [vmem:[%s785_s16 + $0x10] sm:$0x1] %v499_v22 }
  0x2c   : > { %544 = vst [vmem:[%s785_s16 + $0x1a] sm:$0x3] %v536_v23  ;;  %v568_v29 = vmax.f32 %v722_v25, %v730_v27  ;;  %v130_v30 = vld [vmem:[%s780_s13 + $0x19] sm:$0x1]  ;;  %v134_v31 = vld [vmem:[%s780_s13 + $0x1a] sm:$0x1] }
  0x2d   : > { %v138_v32 = vld [vmem:[%s780_s13 + $0x1b] sm:$0x1]  ;;  %575 = vst [vmem:[%s785_s16 + $0x1c] sm:$0xff] %v567_v26  ;;  %v142_v33 = vld [vmem:[%s780_s13 + $0x1c] sm:$0x1]  ;;  %v206_v36 = vmax.f32 %v126_v28, %v130_v30 }
  0x2e   : > { %v146_v34 = vld [vmem:[%s780_s13 + $0x1d] sm:$0x1]  ;;  %v150_v35 = vld [vmem:[%s780_s13 + $0x1e] sm:$0x1]  ;;  %v210_v37 = vmax.f32 %v134_v31, %v138_v32  ;;  %576 = vst [vmem:[%s785_s16 + $0x24] sm:$0x3] %v568_v29 }
  0x2f   : > { %v154_v38 = vld [vmem:[%s780_s13 + $0x1f] sm:$0x1]  ;;  %v158_v39 = vld [vmem:[%s780_s13 + $0x20] sm:$0x1]  ;;  %v162_v40 = vld [vmem:[%s780_s13 + $0x21] sm:$0x1]  ;;  %v214_v41 = vmax.f32 %v142_v33, %v146_v34 }
  0x30   : > { %v166_v42 = vld [vmem:[%s780_s13 + $0x22] sm:$0x1]  ;;  %v170_v43 = vld [vmem:[%s780_s13 + $0x23] sm:$0x1]  ;;  %v174_v44 = vld [vmem:[%s780_s13 + $0x24] sm:$0x1]  ;;  %v218_v45 = vmax.f32 %v150_v35, %v154_v38  ;;  %v222_v46 = vmax.f32 %v158_v39, %v162_v40  ;;  %v246_v47 = vmax.f32 %v206_v36, %v210_v37 }
  0x31   : > { %v178_v48 = vld [vmem:[%s780_s13 + $0x25] sm:$0x1]  ;;  %v182_v49 = vld [vmem:[%s780_s13 + $0x26] sm:$0x1]  ;;  %v186_v50 = vld [vmem:[%s780_s13 + $0x27] sm:$0x1]  ;;  %v226_v51 = vmax.f32 %v166_v42, %v170_v43 }
  0x32   : > { %v190_v52 = vld [vmem:[%s780_s13 + $0x28] sm:$0x1]  ;;  %v194_v53 = vld [vmem:[%s780_s13 + $0x29] sm:$0x1]  ;;  %v198_v54 = vld [vmem:[%s780_s13 + $0x2a] sm:$0x1]  ;;  %v230_v55 = vmax.f32 %v174_v44, %v178_v48  ;;  %v234_v56 = vmax.f32 %v182_v49, %v186_v50  ;;  %v250_v57 = vmax.f32 %v214_v41, %v218_v45 }
  0x33   : > { %v202_v58 = vld [vmem:[%s780_s13 + $0x2b] sm:$0x1]  ;;  %v238_v59 = vmax.f32 %v190_v52, %v194_v53  ;;  %v254_v60 = vmax.f32 %v222_v46, %v226_v51  ;;  %v654_v61 = vld [vmem:[%s780_s13 + $0x18] ss:$7 sm:$0x3] }
  0x34   : > { %v242_v62 = vmax.f32 %v198_v54, %v202_v58  ;;  %v258_v63 = vmax.f32 %v230_v55, %v234_v56  ;;  %v266_v0 = vmax.f32 %v246_v47, %v250_v57  ;;  %v658_v1 = vld [vmem:[%s780_s13 + $0x19] ss:$7 sm:$0x3]  ;;  %v662_v2 = vld [vmem:[%s780_s13 + $0x1a] ss:$7 sm:$0x3] }
  0x35   : > { %v666_v3 = vld [vmem:[%s780_s13 + $0x1b] ss:$7 sm:$0x3]  ;;  %v670_v4 = vld [vmem:[%s780_s13 + $0x1c] ss:$7 sm:$0x3]  ;;  %v341_v5 = vmax.f32 %v654_v61, %v658_v1 }
  0x36   : > { %v262_v6 = vmax.f32 %v238_v59, %v242_v62  ;;  %v270_v7 = vmax.f32 %v254_v60, %v258_v63  ;;  %v674_v8 = vld [vmem:[%s780_s13 + $0x1d] ss:$7 sm:$0x3]  ;;  %v678_v9 = vld [vmem:[%s780_s13 + $0x1e] ss:$7 sm:$0x3]  ;;  %v345_v10 = vmax.f32 %v662_v2, %v666_v3 }
  0x37   : > { %v349_v11 = vmax.f32 %v670_v4, %v674_v8  ;;  %v369_v12 = vld [vmem:[%s780_s13 + $0x26] sm:$0x1]  ;;  %v373_v13 = vld [vmem:[%s780_s13 + $0x27] sm:$0x1]  ;;  %v377_v14 = vld [vmem:[%s780_s13 + $0x28] sm:$0x1] }
  0x38   : > { %v274_v15 = vmax.f32 %v266_v0, %v270_v7  ;;  %v353_v16 = vmax.f32 %v341_v5, %v345_v10  ;;  %v381_v17 = vld [vmem:[%s780_s13 + $0x29] sm:$0x1]  ;;  %v385_v18 = vld [vmem:[%s780_s13 + $0x2a] sm:$0x1]  ;;  %v389_v19 = vld [vmem:[%s780_s13 + $0x2b] sm:$0x1]  ;;  %v393_v20 = vmax.f32 %v369_v12, %v373_v13 }
  0x39   : > { %v357_v21 = vmax.f32 %v349_v11, %v678_v9  ;;  %v397_v22 = vmax.f32 %v377_v14, %v381_v17  ;;  %v401_v23 = vmax.f32 %v385_v18, %v389_v19  ;;  %v681_v24 = vld [vmem:[%s780_s13 + $0x18] ss:$4 sm:$0x1f]  ;;  %v685_v25 = vld [vmem:[%s780_s13 + $0x19] ss:$4 sm:$0x1f] }
  0x3a   : > { %v278_v26 = vmax.f32 %v274_v15, %v262_v6  ;;  %v689_v27 = vld [vmem:[%s780_s13 + $0x1a] ss:$4 sm:$0x1f]  ;;  %v693_v28 = vld [vmem:[%s780_s13 + $0x1b] ss:$4 sm:$0x1f]  ;;  %v440_v29 = vmax.f32 %v681_v24, %v685_v25 }
  0x3b   : > { %v361_v30 = vmax.f32 %v353_v16, %v357_v21  ;;  %v405_v31 = vmax.f32 %v393_v20, %v397_v22  ;;  %v444_v32 = vmax.f32 %v689_v27, %v693_v28  ;;  %v696_v33 = vld [vmem:[%s780_s13 + $0x18] ss:$3 sm:$0x3f]  ;;  %v700_v34 = vld [vmem:[%s780_s13 + $0x19] ss:$3 sm:$0x3f] }
  0x3c   : > { %282 = vst [vmem:[%s785_s16 + $0x30] sm:$0x1] %v278_v26  ;;  %v704_v35 = vld [vmem:[%s780_s13 + $0x1a] ss:$3 sm:$0x3f]  ;;  %v476_v36 = vmax.f32 %v696_v33, %v700_v34 }
  0x3d   : > { %v488_v37 = vld [vmem:[%s780_s13 + $0x2a] sm:$0x1]  ;;  %365 = vst [vmem:[%s785_s16 + $0x31] sm:$0x3] %v361_v30  ;;  %v409_v38 = vmax.f32 %v405_v31, %v401_v23  ;;  %v448_v39 = vmax.f32 %v440_v29, %v444_v32  ;;  %v492_v40 = vld [vmem:[%s780_s13 + $0x2b] sm:$0x1] }
  0x3e   : > { %v708_v41 = vld [vmem:[%s780_s13 + $0x18] ss:$2 sm:$0xff]  ;;  %v716_v42 = vld [vmem:[%s780_s13 + $0x19] ss:$2 sm:$0xff]  ;;  %v480_v43 = vmax.f32 %v476_v36, %v704_v35  ;;  %v496_v44 = vmax.f32 %v488_v37, %v492_v40  ;;  %v127_v55 = vld [vmem:[%s780_s13 + $0x30] sm:$0x1] }
  0x3f   : > { %v537_v45 = vmax.f32 %v708_v41, %v716_v42  ;;  %v709_v46 = vld [vmem:[%s780_s13 + $0x28] ss:$2 sm:$0x3]  ;;  %v717_v47 = vld [vmem:[%s780_s13 + $0x29] ss:$2 sm:$0x3] }
  0x40   : > { %v413_v48 = vmax.f32 %v409_v38, 0.0  ;;  %452 = vst [vmem:[%s785_s16 + $0x34] sm:$0x1f] %v448_v39  ;;  %v538_v49 = vmax.f32 %v709_v46, %v717_v47  ;;  %v723_v50 = vld [vmem:[%s780_s13 + $0x18] ss:$2 sm:$0xff]  ;;  %v500_v52 = vmax.f32 %v496_v44, 0.0 }
  0x41   : > { %v731_v51 = vld [vmem:[%s780_s13 + $0x19] ss:$2 sm:$0xff]  ;;  %484 = vst [vmem:[%s785_s16 + $0x3a] sm:$0x3f] %v480_v43  ;;  %545 = vst [vmem:[%s785_s16 + $0x42] sm:$0xff] %v537_v45 }
  0x42   : > { %v569_v53 = vmax.f32 %v723_v50, %v731_v51  ;;  %v724_v54 = vld [vmem:[%s780_s13 + $0x28] ss:$2 sm:$0x3]  ;;  %417 = vst [vmem:[%s785_s16 + $0x33] sm:$0x1] %v413_v48 }
  0x43   : > { %546 = vst [vmem:[%s785_s16 + $0x4a] sm:$0x3] %v538_v49  ;;  %v732_v56 = vld [vmem:[%s780_s13 + $0x29] ss:$2 sm:$0x3] }
  0x44   : > { %v131_v57 = vld [vmem:[%s780_s13 + $0x31] sm:$0x1]  ;;  %504 = vst [vmem:[%s785_s16 + $0x40] sm:$0x1] %v500_v52  ;;  %577 = vst [vmem:[%s785_s16 + $0x4c] sm:$0xff] %v569_v53  ;;  %v570_v58 = vmax.f32 %v724_v54, %v732_v56 }
  0x45   : > { %v135_v59 = vld [vmem:[%s780_s13 + $0x32] sm:$0x1]  ;;  %v139_v60 = vld [vmem:[%s780_s13 + $0x33] sm:$0x1]  ;;  %v143_v61 = vld [vmem:[%s780_s13 + $0x34] sm:$0x1]  ;;  %v207_v62 = vmax.f32 %v127_v55, %v131_v57 }
  0x46   : > { %v147_v63 = vld [vmem:[%s780_s13 + $0x35] sm:$0x1]  ;;  %v151_v0 = vld [vmem:[%s780_s13 + $0x36] sm:$0x1]  ;;  %v155_v1 = vld [vmem:[%s780_s13 + $0x37] sm:$0x1]  ;;  %v211_v2 = vmax.f32 %v135_v59, %v139_v60 }
  0x47   : > { %578 = vst [vmem:[%s785_s16 + $0x54] sm:$0x3] %v570_v58  ;;  %v159_v3 = vld [vmem:[%s780_s13 + $0x38] sm:$0x1]  ;;  %v163_v4 = vld [vmem:[%s780_s13 + $0x39] sm:$0x1]  ;;  %v215_v6 = vmax.f32 %v143_v61, %v147_v63  ;;  %v219_v7 = vmax.f32 %v151_v0, %v155_v1 }
  0x48   : > { %v167_v5 = vld [vmem:[%s780_s13 + $0x3a] sm:$0x1]  ;;  %v171_v8 = vld [vmem:[%s780_s13 + $0x3b] sm:$0x1]  ;;  %v175_v9 = vld [vmem:[%s780_s13 + $0x3c] sm:$0x1]  ;;  %v223_v11 = vmax.f32 %v159_v3, %v163_v4  ;;  %v247_v12 = vmax.f32 %v207_v62, %v211_v2 }
  0x49   : > { %v179_v10 = vld [vmem:[%s780_s13 + $0x3d] sm:$0x1]  ;;  %v183_v13 = vld [vmem:[%s780_s13 + $0x3e] sm:$0x1]  ;;  %v187_v14 = vld [vmem:[%s780_s13 + $0x3f] sm:$0x1]  ;;  %v227_v16 = vmax.f32 %v167_v5, %v171_v8  ;;  %v251_v18 = vmax.f32 %v215_v6, %v219_v7 }
  0x4a   : > { %v191_v15 = vld [vmem:[%s780_s13 + $0x40] sm:$0x1]  ;;  %v231_v17 = vmax.f32 %v175_v9, %v179_v10  ;;  %v195_v19 = vld [vmem:[%s780_s13 + $0x41] sm:$0x1]  ;;  %v199_v20 = vld [vmem:[%s780_s13 + $0x42] sm:$0x1]  ;;  %v235_v22 = vmax.f32 %v183_v13, %v187_v14 }
  0x4b   : > { %v203_v21 = vld [vmem:[%s780_s13 + $0x43] sm:$0x1]  ;;  %v239_v23 = vmax.f32 %v191_v15, %v195_v19  ;;  %v255_v25 = vmax.f32 %v223_v11, %v227_v16  ;;  %v655_v26 = vld [vmem:[%s780_s13 + $0x30] ss:$7 sm:$0x3]  ;;  %v267_v29 = vmax.f32 %v247_v12, %v251_v18 }
  0x4c   : > { %v243_v24 = vmax.f32 %v199_v20, %v203_v21  ;;  %v659_v27 = vld [vmem:[%s780_s13 + $0x31] ss:$7 sm:$0x3]  ;;  %v259_v28 = vmax.f32 %v231_v17, %v235_v22  ;;  %v663_v30 = vld [vmem:[%s780_s13 + $0x32] ss:$7 sm:$0x3] }
  0x4d   : > { %v667_v31 = vld [vmem:[%s780_s13 + $0x33] ss:$7 sm:$0x3]  ;;  %v342_v32 = vmax.f32 %v655_v26, %v659_v27  ;;  %v671_v33 = vld [vmem:[%s780_s13 + $0x34] ss:$7 sm:$0x3] }
  0x4e   : > { %v675_v34 = vld [vmem:[%s780_s13 + $0x35] ss:$7 sm:$0x3]  ;;  %v346_v35 = vmax.f32 %v663_v30, %v667_v31  ;;  %v263_v36 = vmax.f32 %v239_v23, %v243_v24  ;;  %v271_v37 = vmax.f32 %v255_v25, %v259_v28  ;;  %v679_v38 = vld [vmem:[%s780_s13 + $0x36] ss:$7 sm:$0x3] }
  0x4f   : > { %v350_v39 = vmax.f32 %v671_v33, %v675_v34  ;;  %v370_v40 = vld [vmem:[%s780_s13 + $0x3e] sm:$0x1]  ;;  %v374_v42 = vld [vmem:[%s780_s13 + $0x3f] sm:$0x1]  ;;  %v378_v43 = vld [vmem:[%s780_s13 + $0x40] sm:$0x1] }
  0x50   : > { %v354_v41 = vmax.f32 %v342_v32, %v346_v35  ;;  %v382_v44 = vld [vmem:[%s780_s13 + $0x41] sm:$0x1]  ;;  %v275_v45 = vmax.f32 %v267_v29, %v271_v37  ;;  %v386_v47 = vld [vmem:[%s780_s13 + $0x42] sm:$0x1]  ;;  %v390_v48 = vld [vmem:[%s780_s13 + $0x43] sm:$0x1]  ;;  %v394_v49 = vmax.f32 %v370_v40, %v374_v42 }
  0x51   : > { %v358_v46 = vmax.f32 %v350_v39, %v679_v38  ;;  %v398_v50 = vmax.f32 %v378_v43, %v382_v44  ;;  %v489_v51 = vld [vmem:[%s780_s13 + $0x42] sm:$0x1]  ;;  %v402_v52 = vmax.f32 %v386_v47, %v390_v48  ;;  %v682_v53 = vld [vmem:[%s780_s13 + $0x30] ss:$4 sm:$0x1f] }
  0x52   : > { %v686_v54 = vld [vmem:[%s780_s13 + $0x31] ss:$4 sm:$0x1f]  ;;  %v279_v55 = vmax.f32 %v275_v45, %v263_v36  ;;  %v690_v58 = vld [vmem:[%s780_s13 + $0x32] ss:$4 sm:$0x1f] }
  0x53   : > { %v362_v56 = vmax.f32 %v354_v41, %v358_v46  ;;  %v406_v57 = vmax.f32 %v394_v49, %v398_v50  ;;  %v694_v59 = vld [vmem:[%s780_s13 + $0x33] ss:$4 sm:$0x1f]  ;;  %v441_v60 = vmax.f32 %v682_v53, %v686_v54  ;;  %v710_v6 = vld [vmem:[%s780_s13 + $0x30] ss:$2 sm:$0xff] }
  0x54   : > { %v445_v61 = vmax.f32 %v690_v58, %v694_v59  ;;  %v697_v62 = vld [vmem:[%s780_s13 + $0x30] ss:$3 sm:$0x3f]  ;;  %v701_v63 = vld [vmem:[%s780_s13 + $0x31] ss:$3 sm:$0x3f] }
  0x55   : > { %283 = vst [vmem:[%s785_s16 + $0x60] sm:$0x1] %v279_v55  ;;  %366 = vst [vmem:[%s785_s16 + $0x61] sm:$0x3] %v362_v56  ;;  %v410_v0 = vmax.f32 %v406_v57, %v402_v52  ;;  %v477_v2 = vmax.f32 %v697_v62, %v701_v63  ;;  %v493_v3 = vld [vmem:[%s780_s13 + $0x43] sm:$0x1] }
  0x56   : > { %v705_v1 = vld [vmem:[%s780_s13 + $0x32] ss:$3 sm:$0x3f]  ;;  %v449_v4 = vmax.f32 %v441_v60, %v445_v61  ;;  %v497_v5 = vmax.f32 %v489_v51, %v493_v3  ;;  %v711_v12 = vld [vmem:[%s780_s13 + $0x40] ss:$2 sm:$0x3] }
  0x57   : > { %v718_v7 = vld [vmem:[%s780_s13 + $0x31] ss:$2 sm:$0xff]  ;;  %v725_v8 = vld [vmem:[%s780_s13 + $0x30] ss:$2 sm:$0xff]  ;;  %v414_v9 = vmax.f32 %v410_v0, 0.0  ;;  %v481_v10 = vmax.f32 %v477_v2, %v705_v1 }
  0x58   : > { %v539_v11 = vmax.f32 %v710_v6, %v718_v7  ;;  %v733_v13 = vld [vmem:[%s780_s13 + $0x31] ss:$2 sm:$0xff]  ;;  %453 = vst [vmem:[%s785_s16 + $0x64] sm:$0x1f] %v449_v4  ;;  %v501_v14 = vmax.f32 %v497_v5, 0.0 }
  0x59   : > { %v719_v15 = vld [vmem:[%s780_s13 + $0x41] ss:$2 sm:$0x3]  ;;  %v571_v16 = vmax.f32 %v725_v8, %v733_v13  ;;  %v128_v17 = vld [vmem:[%s780_s13 + $0x48] sm:$0x1] }
  0x5a   : > { %418 = vst [vmem:[%s785_s16 + $0x63] sm:$0x1] %v414_v9  ;;  %485 = vst [vmem:[%s785_s16 + $0x6a] sm:$0x3f] %v481_v10  ;;  %v540_v18 = vmax.f32 %v711_v12, %v719_v15  ;;  %v132_v22 = vld [vmem:[%s780_s13 + $0x49] sm:$0x1] }
  0x5b   : > { %547 = vst [vmem:[%s785_s16 + $0x72] sm:$0xff] %v539_v11  ;;  %v726_v19 = vld [vmem:[%s780_s13 + $0x40] ss:$2 sm:$0x3]  ;;  %505 = vst [vmem:[%s785_s16 + $0x70] sm:$0x1] %v501_v14  ;;  %v208_v28 = vmax.f32 %v128_v17, %v132_v22 }
  0x5c   : > { %v734_v20 = vld [vmem:[%s780_s13 + $0x41] ss:$2 sm:$0x3]  ;;  %579 = vst [vmem:[%s785_s16 + $0x7c] sm:$0xff] %v571_v16  ;;  %v136_v23 = vld [vmem:[%s780_s13 + $0x4a] sm:$0x1] }
  0x5d   : > { %v572_v21 = vmax.f32 %v726_v19, %v734_v20  ;;  %v140_v24 = vld [vmem:[%s780_s13 + $0x4b] sm:$0x1]  ;;  %548 = vst [vmem:[%s785_s16 + $0x7a] sm:$0x3] %v540_v18  ;;  %v144_v25 = vld [vmem:[%s780_s13 + $0x4c] sm:$0x1] }
  0x5e   : > { %v148_v26 = vld [vmem:[%s780_s13 + $0x4d] sm:$0x1]  ;;  %v152_v27 = vld [vmem:[%s780_s13 + $0x4e] sm:$0x1]  ;;  %v212_v29 = vmax.f32 %v136_v23, %v140_v24  ;;  %v156_v30 = vld [vmem:[%s780_s13 + $0x4f] sm:$0x1] }
  0x5f   : > { %580 = vst [vmem:[%s785_s16 + $0x84] sm:$0x3] %v572_v21  ;;  %v160_v31 = vld [vmem:[%s780_s13 + $0x50] sm:$0x1]  ;;  %v164_v32 = vld [vmem:[%s780_s13 + $0x51] sm:$0x1]  ;;  %v216_v33 = vmax.f32 %v144_v25, %v148_v26  ;;  %v220_v37 = vmax.f32 %v152_v27, %v156_v30 }
  0x60   : > { %v168_v34 = vld [vmem:[%s780_s13 + $0x52] sm:$0x1]  ;;  %v172_v35 = vld [vmem:[%s780_s13 + $0x53] sm:$0x1]  ;;  %v176_v36 = vld [vmem:[%s780_s13 + $0x54] sm:$0x1]  ;;  %v224_v38 = vmax.f32 %v160_v31, %v164_v32  ;;  %v248_v39 = vmax.f32 %v208_v28, %v212_v29 }
  0x61   : > { %v180_v40 = vld [vmem:[%s780_s13 + $0x55] sm:$0x1]  ;;  %v184_v41 = vld [vmem:[%s780_s13 + $0x56] sm:$0x1]  ;;  %v188_v42 = vld [vmem:[%s780_s13 + $0x57] sm:$0x1]  ;;  %v228_v43 = vmax.f32 %v168_v34, %v172_v35  ;;  %v252_v49 = vmax.f32 %v216_v33, %v220_v37 }
  0x62   : > { %v192_v44 = vld [vmem:[%s780_s13 + $0x58] sm:$0x1]  ;;  %v196_v45 = vld [vmem:[%s780_s13 + $0x59] sm:$0x1]  ;;  %v200_v46 = vld [vmem:[%s780_s13 + $0x5a] sm:$0x1]  ;;  %v232_v47 = vmax.f32 %v176_v36, %v180_v40  ;;  %v236_v48 = vmax.f32 %v184_v41, %v188_v42 }
  0x63   : > { %v204_v50 = vld [vmem:[%s780_s13 + $0x5b] sm:$0x1]  ;;  %v240_v51 = vmax.f32 %v192_v44, %v196_v45  ;;  %v256_v52 = vmax.f32 %v224_v38, %v228_v43  ;;  %v656_v53 = vld [vmem:[%s780_s13 + $0x48] ss:$7 sm:$0x3]  ;;  %v268_v56 = vmax.f32 %v248_v39, %v252_v49 }
  0x64   : > { %v244_v54 = vmax.f32 %v200_v46, %v204_v50  ;;  %v260_v55 = vmax.f32 %v232_v47, %v236_v48  ;;  %v660_v57 = vld [vmem:[%s780_s13 + $0x49] ss:$7 sm:$0x3]  ;;  %v664_v58 = vld [vmem:[%s780_s13 + $0x4a] ss:$7 sm:$0x3] }
  0x65   : > { %v668_v59 = vld [vmem:[%s780_s13 + $0x4b] ss:$7 sm:$0x3]  ;;  %v672_v60 = vld [vmem:[%s780_s13 + $0x4c] ss:$7 sm:$0x3]  ;;  %v343_v61 = vmax.f32 %v656_v53, %v660_v57 }
  0x66   : > { %v264_v62 = vmax.f32 %v240_v51, %v244_v54  ;;  %v272_v63 = vmax.f32 %v256_v52, %v260_v55  ;;  %v676_v0 = vld [vmem:[%s780_s13 + $0x4d] ss:$7 sm:$0x3]  ;;  %v680_v1 = vld [vmem:[%s780_s13 + $0x4e] ss:$7 sm:$0x3]  ;;  %v347_v2 = vmax.f32 %v664_v58, %v668_v59 }
  0x67   : > { %v351_v3 = vmax.f32 %v672_v60, %v676_v0  ;;  %v371_v4 = vld [vmem:[%s780_s13 + $0x56] sm:$0x1]  ;;  %v375_v5 = vld [vmem:[%s780_s13 + $0x57] sm:$0x1]  ;;  %v379_v6 = vld [vmem:[%s780_s13 + $0x58] sm:$0x1] }
  0x68   : > { %v276_v7 = vmax.f32 %v268_v56, %v272_v63  ;;  %v355_v8 = vmax.f32 %v343_v61, %v347_v2  ;;  %v383_v9 = vld [vmem:[%s780_s13 + $0x59] sm:$0x1]  ;;  %v387_v10 = vld [vmem:[%s780_s13 + $0x5a] sm:$0x1]  ;;  %v391_v11 = vld [vmem:[%s780_s13 + $0x5b] sm:$0x1]  ;;  %v395_v12 = vmax.f32 %v371_v4, %v375_v5 }
  0x69   : > { %v359_v13 = vmax.f32 %v351_v3, %v680_v1  ;;  %v399_v14 = vmax.f32 %v379_v6, %v383_v9  ;;  %v403_v15 = vmax.f32 %v387_v10, %v391_v11  ;;  %v683_v16 = vld [vmem:[%s780_s13 + $0x48] ss:$4 sm:$0x1f]  ;;  %v687_v17 = vld [vmem:[%s780_s13 + $0x49] ss:$4 sm:$0x1f] }
  0x6a   : > { %v280_v18 = vmax.f32 %v276_v7, %v264_v62  ;;  %v691_v19 = vld [vmem:[%s780_s13 + $0x4a] ss:$4 sm:$0x1f]  ;;  %v695_v20 = vld [vmem:[%s780_s13 + $0x4b] ss:$4 sm:$0x1f]  ;;  %v442_v21 = vmax.f32 %v683_v16, %v687_v17 }
  0x6b   : > { %v363_v22 = vmax.f32 %v355_v8, %v359_v13  ;;  %v407_v23 = vmax.f32 %v395_v12, %v399_v14  ;;  %v446_v24 = vmax.f32 %v691_v19, %v695_v20  ;;  %v698_v25 = vld [vmem:[%s780_s13 + $0x48] ss:$3 sm:$0x3f]  ;;  %v702_v26 = vld [vmem:[%s780_s13 + $0x49] ss:$3 sm:$0x3f] }
  0x6c   : > { %284 = vst [vmem:[%s785_s16 + $0x90] sm:$0x1] %v280_v18  ;;  %v706_v27 = vld [vmem:[%s780_s13 + $0x4a] ss:$3 sm:$0x3f]  ;;  %v478_v28 = vmax.f32 %v698_v25, %v702_v26 }
  0x6d   : > { %v490_v29 = vld [vmem:[%s780_s13 + $0x5a] sm:$0x1]  ;;  %367 = vst [vmem:[%s785_s16 + $0x91] sm:$0x3] %v363_v22  ;;  %v411_v30 = vmax.f32 %v407_v23, %v403_v15  ;;  %v450_v31 = vmax.f32 %v442_v21, %v446_v24  ;;  %v494_v32 = vld [vmem:[%s780_s13 + $0x5b] sm:$0x1] }
  0x6e   : > { %v712_v33 = vld [vmem:[%s780_s13 + $0x48] ss:$2 sm:$0xff]  ;;  %v720_v34 = vld [vmem:[%s780_s13 + $0x49] ss:$2 sm:$0xff]  ;;  %v482_v35 = vmax.f32 %v478_v28, %v706_v27  ;;  %v498_v36 = vmax.f32 %v490_v29, %v494_v32 }
  0x6f   : > { %v541_v37 = vmax.f32 %v712_v33, %v720_v34  ;;  %v713_v38 = vld [vmem:[%s780_s13 + $0x58] ss:$2 sm:$0x3]  ;;  %v721_v39 = vld [vmem:[%s780_s13 + $0x59] ss:$2 sm:$0x3] }
  0x70   : > { %v415_v40 = vmax.f32 %v411_v30, 0.0  ;;  %454 = vst [vmem:[%s785_s16 + $0x94] sm:$0x1f] %v450_v31  ;;  %v542_v41 = vmax.f32 %v713_v38, %v721_v39  ;;  %v727_v42 = vld [vmem:[%s780_s13 + $0x48] ss:$2 sm:$0xff]  ;;  %v502_v44 = vmax.f32 %v498_v36, 0.0 }
  0x71   : > { %v735_v43 = vld [vmem:[%s780_s13 + $0x49] ss:$2 sm:$0xff]  ;;  %486 = vst [vmem:[%s785_s16 + $0x9a] sm:$0x3f] %v482_v35  ;;  %549 = vst [vmem:[%s785_s16 + $0xa2] sm:$0xff] %v541_v37 }
  0x72   : > { %v573_v45 = vmax.f32 %v727_v42, %v735_v43  ;;  %v728_v46 = vld [vmem:[%s780_s13 + $0x58] ss:$2 sm:$0x3]  ;;  %419 = vst [vmem:[%s785_s16 + $0x93] sm:$0x1] %v415_v40 }
  0x73   : > { %550 = vst [vmem:[%s785_s16 + $0xaa] sm:$0x3] %v542_v41  ;;  %v736_v47 = vld [vmem:[%s780_s13 + $0x59] ss:$2 sm:$0x3] }
  0x74   : > { %506 = vst [vmem:[%s785_s16 + $0xa0] sm:$0x1] %v502_v44  ;;  %581 = vst [vmem:[%s785_s16 + $0xac] sm:$0xff] %v573_v45  ;;  %v574_v48 = vmax.f32 %v728_v46, %v736_v47 }
  0x76   : > { %582 = vst [vmem:[%s785_s16 + $0xb4] sm:$0x3] %v574_v48 }
  0x77 PF: > { %s11_s6 = sadd.s32 1, %s756_s6  }
  0x78   : > { %p8_p4 = scmp.ge.s32.totalorder %s11_s6, 4  }
  0x7a   :  { %10 = sbr.rel (!%p8_p4) target bundleno = 1 (0x1), region = 96 }

</bundles_post_ra>
